<compile_context>
chip_gen: v6e
topology: v6e:2x2x1
jax: 0.10.0
libtpu: 0.0.40
codegen_flags: <defaults>
</compile_context>

<pallas_src>
import functools
import math

import jax
import jax.numpy as jnp
from jax.experimental import pallas as pl
from jax.experimental.pallas import tpu as pltpu

_NUM_ITERS = 5  # fixed-point iterations for the t2 > 1 tempered softmax


# ----------------------------- static (Python) helpers -----------------------------

def _log_t_py(u, t):
    if t == 1.0:
        return math.log(u)
    return (u ** (1.0 - t) - 1.0) / (1.0 - t)


# ----------------------------- in-kernel helpers ------------------------------------

def _int_pow(u, k):
    """u ** k for a static positive integer k, via repeated squaring (VALU only)."""
    assert k >= 1
    result = None
    base = u
    while k:
        if k & 1:
            result = base if result is None else result * base
        k >>= 1
        if k:
            base = base * base
    return result


def _pow_static(u, p):
    """u ** p for a static Python exponent, using cheap EUP/VALU forms when possible."""
    p = float(p)
    if p == 0.0:
        return jnp.ones_like(u)
    if p == 1.0:
        return u
    if p == 2.0:
        return u * u
    if p == 3.0:
        return u * u * u
    if p == 0.5:
        return jnp.sqrt(u)
    if p == 1.5:
        return u * jnp.sqrt(u)
    if p == -0.5:
        return jax.lax.rsqrt(u)
    if p == -1.0:
        return pl.reciprocal(u, approx=True)
    if p == -1.5:
        return jax.lax.rsqrt(u) * pl.reciprocal(u, approx=True)
    if p == -2.0:
        r = pl.reciprocal(u, approx=True)
        return r * r
    if p < 0.0 and p.is_integer() and p >= -16.0:
        # e.g. t2 = 1.25 -> p = -4, t2 = 1.2 -> p = -5: reciprocal + repeated squaring.
        return _int_pow(pl.reciprocal(u, approx=True), int(-p))
    if p > 0.0 and p.is_integer() and p <= 16.0:
        return _int_pow(u, int(p))
    # Generic fractional exponent: exp(p * log(u)) -- 2 EUP passes, explicit.
    return jnp.exp(p * jnp.log(u))


def _exp_t(u, t):
    """Tempered exp (static t), in-kernel."""
    if t == 1.0:
        return jnp.exp(u)
    return _pow_static(jnp.maximum(1.0 + (1.0 - t) * u, 0.0), 1.0 / (1.0 - t))


# ----------------------------- kernel ------------------------------------------------

def _bitempered_kernel(logits_ref, labels_ref, out_ref, *,
                       t1, t2, smoothing, n_rows, tile_n):
    i = pl.program_id(0)
    x = logits_ref[...].astype(jnp.float32)        # (TILE_N, C)
    lbl = labels_ref[...]                          # (TILE_N, 1) int32
    tn, c = x.shape

    # One-hot mask from a (1, C) iota broadcast against (TILE_N, 1) labels
    # (no tile-sized int32 temporary).
    class_ids = jax.lax.broadcasted_iota(jnp.int32, (1, c), 1)
    hot = class_ids == lbl                         # (TILE_N, C) bool

    # Smoothed label values (static Python floats).
    if smoothing > 0.0:
        y_on = 1.0 - smoothing
        y_off = smoothing / (c - 1)
    else:
        y_on, y_off = 1.0, 0.0

    # ---- tempered softmax over the class (lane) axis ----
    if t2 == 1.0:
        m = jnp.max(x, axis=-1, keepdims=True)
        e = jnp.exp(x - m)
        s = jnp.sum(e, axis=-1, keepdims=True)
        probs = e * pl.reciprocal(s, approx=True)
    elif t2 > 1.0:
        # Fixed-point normalization (compute_normalization_fixed_point).
        mu = jnp.max(x, axis=-1, keepdims=True)
        a0 = x - mu
        a = a0
        for _ in range(_NUM_ITERS):
            z = jnp.sum(_exp_t(a, t2), axis=-1, keepdims=True)
            a = a0 * _pow_static(z, 1.0 - t2)
        z = jnp.sum(_exp_t(a, t2), axis=-1, keepdims=True)
        # -log_t(1/z, t2) == (z**(t2-1) - 1) / (t2 - 1)   (avoids a reciprocal)
        norm = (_pow_static(z, t2 - 1.0) - 1.0) / (t2 - 1.0) + mu
        probs = _exp_t(x - norm, t2)
    else:
        # Guarded in the wrapper; never reached.
        raise NotImplementedError("t2 < 1.0 normalization not implemented")

    # ---- label-only terms folded into static constants ----
    #   A(y) = y * log_t(y + 1e-10, t1) - y**(2-t1)/(2-t1)
    a_on = y_on * _log_t_py(y_on + 1e-10, t1) - y_on ** (2.0 - t1) / (2.0 - t1)

    # ---- probability terms, special-cased for the static t1 ----
    if t1 == 1.0:
        logt_p = jnp.log(probs)
        pow_term = probs                                   # probs**(2-1)/(2-1)
    elif t1 == 0.5:
        sp = jnp.sqrt(probs)                               # shared single sqrt
        logt_p = 2.0 * (sp - 1.0)                          # log_t(probs, 0.5)
        pow_term = probs * sp * (1.0 / 1.5)                # probs**1.5 / 1.5
    else:
        logt_p = (_pow_static(probs, 1.0 - t1) - 1.0) / (1.0 - t1)
        pow_term = _pow_static(probs, 2.0 - t1) * (1.0 / (2.0 - t1))

    if smoothing == 0.0:
        # Fast path: y_off == 0 and a_off == 0 exactly, y_on == 1.
        loss = pow_term + jnp.where(hot, a_on - logt_p, 0.0)
    else:
        a_off = (y_off * _log_t_py(y_off + 1e-10, t1)
                 - y_off ** (2.0 - t1) / (2.0 - t1))
        y = jnp.where(hot, jnp.float32(y_on), jnp.float32(y_off))
        a_const = jnp.where(hot, jnp.float32(a_on), jnp.float32(a_off))
        loss = a_const - y * logt_p + pow_term             # (TILE_N, C)

    # Per-tile, per-class partial sums -> one lane-dense store per grid step.
    def _store(masked_loss):
        out_ref[...] = jnp.sum(masked_loss, axis=0, keepdims=True).reshape(1, 1, c)

    needs_mask = (n_rows % tile_n) != 0  # static Python bool
    if needs_mask:
        last = pl.num_programs(0) - 1

        @pl.when(i == last)
        def _():
            row_ids = jax.lax.broadcasted_iota(jnp.int32, (tn, 1), 0) + i * tile_n
            _store(jnp.where(row_ids < n_rows, loss, 0.0))

        @pl.when(i != last)
        def _():
            _store(loss)
    else:
        _store(loss)


# ----------------------------- wrapper ------------------------------------------------

def _per_row_vmem_bytes(c, itemsize, t2):
    """Approximate VMEM bytes per batch row.

    2 buffers of the logits stream + 2 buffers of the (TILE_N, 1) int32 label block
    (lane-padded to 128 lanes -> 512 B/row) + tile-sized f32 temporaries.
    """
    n_tmp = 8 if t2 == 1.0 else 10
    return 2 * (c * itemsize + 128 * 4) + n_tmp * c * 4


def _choose_tile_n(n, c, itemsize, t2,
                   target_logits_bytes=1 << 20,
                   vmem_budget_bytes=16 << 20,
                   min_tiles=2):
    """Pick a batch tile: multiple of 8, ~1 MiB of logits per step, VMEM-bounded,
    and (when N allows) at least `min_tiles` grid steps for v7x megacore."""
    if n <= 8:
        return n
    per_row = _per_row_vmem_bytes(c, itemsize, t2)
    rows = max(8, target_logits_bytes // max(1, c * itemsize))
    rows = min(rows, max(8, vmem_budget_bytes // per_row))
    if n >= 8 * min_tiles:
        # Cap so the 'parallel' grid axis has >= min_tiles steps (both v7x TCs busy).
        cap = ((pl.cdiv(n, min_tiles) + 7) // 8) * 8
        rows = min(rows, cap)
    rows = max(8, (min(rows, n) // 8) * 8)
    if rows >= n:
        return n
    return rows


def bi_tempered_logistic_loss_mean(logits, labels, t1=0.5, t2=1.0, smoothing=0.0):
    """Mean bi-tempered logistic loss. `labels` are integer class indices (N,)."""
    if t2 < 1.0:
        # TODO(synk): t2 < 1.0 needs the binary-search normalization; not implemented.
        raise NotImplementedError("t2 < 1.0 normalization not implemented")

    n, c = logits.shape
    labels2d = labels.astype(jnp.int32).reshape(n, 1)

    itemsize = jnp.dtype(logits.dtype).itemsize
    tile_n = _choose_tile_n(n, c, itemsize, float(t2))
    num_tiles = pl.cdiv(n, tile_n)

    # VMEM limit derived from the same model as the tile choice (+ headroom),
    # kept within the v7x 32 MiB scoped default.
    vmem_needed = _per_row_vmem_bytes(c, itemsize, float(t2)) * tile_n + (4 << 20)
    vmem_limit = int(max(8 << 20, min(vmem_needed, 32 << 20)))

    kernel = functools.partial(
        _bitempered_kernel, t1=float(t1), t2=float(t2),
        smoothing=float(smoothing), n_rows=n, tile_n=tile_n)

    partials = pl.pallas_call(
        kernel,
        out_shape=jax.ShapeDtypeStruct((num_tiles, 1, c), jnp.float32),
        grid=(num_tiles,),
        in_specs=[
            pl.BlockSpec((tile_n, c), lambda i: (i, 0)),
            pl.BlockSpec((tile_n, 1), lambda i: (i, 0)),
        ],
        out_specs=pl.BlockSpec((1, 1, c), lambda i: (i, 0, 0)),
        compiler_params=pltpu.CompilerParams(
            dimension_semantics=("parallel",),
            vmem_limit_bytes=vmem_limit,
        ),
    )(logits, labels2d)

    return jnp.sum(partials) / n


# ----------------------------- pure-JAX reference ------------------------------------

def _log_t_ref(u, t):
    if t == 1.0:
        return jnp.log(u)
    return (u ** (1.0 - t) - 1.0) / (1.0 - t)


def _exp_t_ref(u, t):
    if t == 1.0:
        return jnp.exp(u)
    return jnp.maximum(1.0 + (1.0 - t) * u, 0.0) ** (1.0 / (1.0 - t))


def _reference_loss(logits, labels, t1, t2, smoothing):
    x = logits.astype(jnp.float32)
    n, c = x.shape
    y = jax.nn.one_hot(labels, c, dtype=jnp.float32)
    if smoothing > 0.0:
        y = (1.0 - c / (c - 1) * smoothing) * y + smoothing / (c - 1)
    if t2 == 1.0:
        probs = jax.nn.softmax(x, axis=-1)
    else:
        mu = jnp.max(x, axis=-1, keepdims=True)
        a0 = x - mu
        a = a0
        for _ in range(_NUM_ITERS):
            z = jnp.sum(_exp_t_ref(a, t2), axis=-1, keepdims=True)
            a = a0 * z ** (1.0 - t2)
        z = jnp.sum(_exp_t_ref(a, t2), axis=-1, keepdims=True)
        norm = -_log_t_ref(1.0 / z, t2) + mu
        probs = _exp_t_ref(x - norm, t2)
    loss = (y * _log_t_ref(y + 1e-10, t1)
            - y * _log_t_ref(probs, t1)
            - y ** (2.0 - t1) / (2.0 - t1)
            + probs ** (2.0 - t1) / (2.0 - t1))
    return jnp.mean(jnp.sum(loss, axis=-1))


# ----------------------------- demo / self-check --------------------------------------

if __name__ == "__main__":
    key = jax.random.PRNGKey(0)
    k1, k2, k3, k4 = jax.random.split(key, 4)

    # Test 1: default config (t1=0.5, t2=1.0, smoothing=0.0), N=8, C=16.
    N, C = 8, 16
    logit_label = jax.random.normal(k1, (N, C), dtype=jnp.float32)
    truth_label = jax.random.randint(k2, (N,), 0, C)

    loss = bi_tempered_logistic_loss_mean(logit_label, truth_label,
                                          t1=0.5, t2=1.0, smoothing=0.0)
    loss = jax.block_until_ready(loss)
    ref = _reference_loss(logit_label, truth_label, 0.5, 1.0, 0.0)
    assert abs(float(loss) - float(ref)) < 5e-3, (float(loss), float(ref))

    # Test 2: non-multiple batch (masked last tile, 2 grid steps),
    # t2 > 1 fixed-point path + label smoothing.
    N2, C2 = 12, 16
    logit2 = jax.random.normal(k3, (N2, C2), dtype=jnp.float32)
    truth2 = jax.random.randint(k4, (N2,), 0, C2)

    loss2 = bi_tempered_logistic_loss_mean(logit2, truth2,
                                           t1=0.7, t2=1.3, smoothing=0.1)
    loss2 = jax.block_until_ready(loss2)
    ref2 = _reference_loss(logit2, truth2, 0.7, 1.3, 0.1)
    assert abs(float(loss2) - float(ref2)) < 5e-3, (float(loss2), float(ref2))

    print("KERNEL_OK")
</pallas_src>

<mosaic_0001>
module attributes {stable_mosaic.version = 11 : i64} {
  func.func @_bitempered_kernel(%arg0: i32, %arg1: memref<8x16xf32, #tpu.memory_space<vmem>>, %arg2: memref<8x1xi32, #tpu.memory_space<vmem>>, %arg3: memref<1x1x16xf32, #tpu.memory_space<vmem>>) attributes {dimension_semantics = [#tpu.dimension_semantics<parallel>], iteration_bounds = array<i64: 1>, scalar_prefetch = 0 : i64, scratch_operands = 0 : i64, tpu.core_type = #tpu.core_type<tc>, window_params = [{transform_indices = @transform_0, window_bounds = array<i64: 8, 16>}, {transform_indices = @transform_1, window_bounds = array<i64: 8, 1>}, {transform_indices = @transform_2, window_bounds = array<i64: 1, 1, 16>}]} {
    %c0 = arith.constant 0 : index
    %c0_0 = arith.constant 0 : index
    %0 = vector.load %arg1[%c0, %c0_0] : memref<8x16xf32, #tpu.memory_space<vmem>>, vector<8x16xf32>
    %c0_1 = arith.constant 0 : index
    %c0_2 = arith.constant 0 : index
    %1 = vector.load %arg2[%c0_1, %c0_2] : memref<8x1xi32, #tpu.memory_space<vmem>>, vector<8x1xi32>
    %2 = tpu.iota {dimensions = array<i32: 1>} : vector<1x16xi32>
    %3 = vector.broadcast %2 : vector<1x16xi32> to vector<8x16xi32>
    %4 = vector.broadcast %1 : vector<8x1xi32> to vector<8x16xi32>
    %5 = arith.cmpi eq, %3, %4 : vector<8x16xi32>
    %cst = arith.constant dense<0xFF800000> : vector<8xf32>
    %6 = vector.multi_reduction <maximumf>, %0, %cst [1] : vector<8x16xf32> to vector<8xf32>
    %7 = vector.shape_cast %6 : vector<8xf32> to vector<8x1xf32>
    %8 = vector.broadcast %7 : vector<8x1xf32> to vector<8x16xf32>
    %9 = arith.subf %0, %8 : vector<8x16xf32>
    %10 = math.exp %9 : vector<8x16xf32>
    %cst_3 = arith.constant dense<0.000000e+00> : vector<8xf32>
    %11 = vector.multi_reduction <add>, %10, %cst_3 [1] : vector<8x16xf32> to vector<8xf32>
    %12 = vector.shape_cast %11 : vector<8xf32> to vector<8x1xf32>
    %13 = tpu.reciprocal %12 {approx = true} : vector<8x1xf32> -> vector<8x1xf32>
    %14 = vector.broadcast %13 : vector<8x1xf32> to vector<8x16xf32>
    %15 = arith.mulf %10, %14 : vector<8x16xf32>
    %16 = math.sqrt %15 : vector<8x16xf32>
    %cst_4 = arith.constant 1.000000e+00 : f32
    %17 = vector.broadcast %cst_4 : f32 to vector<8x16xf32>
    %18 = arith.subf %16, %17 : vector<8x16xf32>
    %cst_5 = arith.constant 2.000000e+00 : f32
    %19 = vector.broadcast %cst_5 : f32 to vector<8x16xf32>
    %20 = arith.mulf %19, %18 : vector<8x16xf32>
    %21 = arith.mulf %15, %16 : vector<8x16xf32>
    %cst_6 = arith.constant 0.666666686 : f32
    %22 = vector.broadcast %cst_6 : f32 to vector<8x16xf32>
    %23 = arith.mulf %21, %22 : vector<8x16xf32>
    %cst_7 = arith.constant -0.666666686 : f32
    %24 = vector.broadcast %cst_7 : f32 to vector<8x16xf32>
    %25 = arith.subf %24, %20 : vector<8x16xf32>
    %cst_8 = arith.constant 0.000000e+00 : f32
    %26 = vector.broadcast %cst_8 : f32 to vector<8x16xf32>
    %27 = arith.select %5, %25, %26 : vector<8x16xi1>, vector<8x16xf32>
    %28 = arith.addf %23, %27 : vector<8x16xf32>
    %cst_9 = arith.constant dense<0.000000e+00> : vector<16xf32>
    %29 = vector.multi_reduction <add>, %28, %cst_9 [0] : vector<8x16xf32> to vector<16xf32>
    %30 = vector.shape_cast %29 : vector<16xf32> to vector<1x16xf32>
    %31 = vector.shape_cast %30 : vector<1x16xf32> to vector<1x1x16xf32>
    %c0_10 = arith.constant 0 : index
    %c0_11 = arith.constant 0 : index
    %c0_12 = arith.constant 0 : index
    %32 = vector.load %arg3[%c0_10, %c0_11, %c0_12] : memref<1x1x16xf32, #tpu.memory_space<vmem>>, vector<1x1x16xf32>
    tpu.vector_store %arg3[%c0_10, %c0_11, %c0_12], %31 {strides = array<i32>} : memref<1x1x16xf32, #tpu.memory_space<vmem>>, vector<1x1x16xf32>,
    return
  }
  func.func @transform_0(%arg0: i32) -> (i32, i32) {
    %c0_i32 = arith.constant 0 : i32
    %c0_i32_0 = arith.constant 0 : i32
    return %arg0, %c0_i32 : i32, i32
  }
  func.func @transform_1(%arg0: i32) -> (i32, i32) {
    %c0_i32 = arith.constant 0 : i32
    %c0_i32_0 = arith.constant 0 : i32
    return %arg0, %c0_i32 : i32, i32
  }
  func.func @transform_2(%arg0: i32) -> (i32, i32, i32) {
    %c0_i32 = arith.constant 0 : i32
    %c0_i32_0 = arith.constant 0 : i32
    %c0_i32_1 = arith.constant 0 : i32
    return %arg0, %c0_i32, %c0_i32_0 : i32, i32, i32
  }
}

</mosaic_0001>

<bundles_post_ra>
// kernel: tpu_custom_call.1
= control target key start
LH: loop header
LB: loop body
LE: loop exit
PB: predicated region body
PF: predicated region fallthrough
CT: control target
= control target key end

     0   :  { %vm20_vm0 = vcmask 130048   ;;  %s131_s0 = inlined_call_operand.vmem [shape: f32[8,16], index: 0, kind: input, shape index: {}]   ;;  %s132_s1 = inlined_call_operand.vmem [shape: s32[8,1], index: 1, kind: input, shape index: {}]   ;;  %s133_s2 = inlined_call_operand.hbm [shape: f32[1,1,16], index: 2, kind: output, shape index: {}]  }
   0x1   :  { %v12_v0 = vld [vmem:[%s131_s0] sm:$0xff] }
   0x2   :  { %7 = vsyncpa [#allocation3], 0  ;;  %v21_v1 = vsel %vm20_vm0, %v12_v0, -inf  ;;  %v13_v2 = vld [vmem:[%s132_s1] sm:$0xff]  ;;  %v102_v3 = vmov 0   ;;  %v14_v13 = vlaneseq  ;;  %s103_s0 = smov [#allocation2]  }
   0x3   :  { %22 = vmax.xlane.f32.xlu0 %v21_v1  ;;  %72 = vset.pattern.permute.xlu1 %v102_v3  ;;  %s61_s1 = sshll.u32 %s103_s0, 4  ;;  %vm53_vm4 = vcmask 122880   ;;  %s62_s1 = int_to_ptr.vmem [resolvable:$true] %s61_s1 }
   0x4   :  { %73 = vset.pattern.permute.xlu0 %v102_v3  ;;  %17 = vperm.xlu1 %72, %v13_v2   ;;  %v15_v17 = vand.u32 127, %v14_v13  ;;  %s80_s13 = scalar_lea.vmem %s62_s1, 16  ;;  %s84_s14 = scalar_lea.vmem %s62_s1, 32 }
   0x5   :  { %p81_p0 = scmp.ne.s32.totalorder %s62_s1, %s80_s13  ;;  %p85_p1 = scmp.lt.s32.totalorder %s62_s1, %s62_s1 }
   0x6   :  { %p86_p2 = scmp.lt.s32.totalorder %s84_s14, %s80_s13 }
   0x8   :  { %p87_p3 = por %p86_p2, %p85_p1 }
   0xa   :  { %p88_p4 = pnand %p87_p3, %p81_p0 }
  0x7f   :  { %v18_v19 = vpop.permute.xlu1 %17 }
  0x80   :  { %vm19_vm3 = vcmp.eq.s32.totalorder %v15_v17, %v18_v19 }
  0x8c   :  { %v23_v4 = vpop.xlane.xlu0 %22 }
  0x8d   :  { %v24_v5 = vsub.f32 %v12_v0, %v23_v4 }
  0x8f   :  { %v25_v6 = vmul.f32 1.442695, %v24_v5 }
  0x91   :  { %74 = vpow2.f32 %v25_v6 }
  0x9e   :  { %v75_v7 = vpop.eup %74 }
  0x9f   :  { %v27_v8 = vsel %vm20_vm0, %v75_v7, 0.0 }
  0xa0   :  { %28 = vadd.xlane.f32.xlu0 %v27_v8 }
 0x129   :  { %v29_v9 = vpop.xlane.xlu0 %28 }
 0x12a   :  { %76 = vrcp.f32 %v29_v9 }
 0x137   :  { %v77_v10 = vpop.eup %76 }
 0x138   :  { %v31_v11 = vmul.f32 %v77_v10, %v75_v7 }
 0x13a   :  { %78 = vrsqrt.f32 %v31_v11  ;;  %vm34_vm1 = vcmp.eq.f32.partialorder %v31_v11, inf  ;;  %v37_v15 = vand.u32 2147483648, %v31_v11  ;;  %vm36_vm2 = vcmp.eq.f32.partialorder %v31_v11, 0.0 }
 0x147   :  { %v79_v12 = vpop.eup %78 }
 0x148   :  { %v33_v14 = vmul.f32 %v79_v12, %v31_v11 }
 0x14a   :  { %v35_v16 = vsel %vm34_vm1, %v31_v11, %v33_v14 }
 0x14b   :  { %v38_v18 = vsel %vm36_vm2, %v37_v15, %v35_v16 }
 0x14c   :  { %v69_v20 = vadd.f32 -1.0, %v38_v18  ;;  %v41_v21 = vmul.f32 %v38_v18, %v31_v11 }
 0x14e   :  { %v40_v22 = vmul.f32 2.0, %v69_v20  ;;  %v42_v24 = vmul.f32 0.6666667, %v41_v21 }
 0x150   :  { %v43_v23 = vsub.f32 -0.6666667, %v40_v22 }
 0x152   :  { %v44_v25 = vsel %vm19_vm3, %v43_v23, 0.0 }
 0x153   :  { %v45_v26 = vadd.f32 %v44_v25, %v42_v24 }
 0x155   :  { %v46_v27 = vsel %vm20_vm0, %v45_v26, 0.0 }
 0x156   :  { %v47_v28 = vrot.slane %v46_v27, 4 }
 0x158   :  { %v48_v29 = vadd.f32 %v47_v28, %v46_v27 }
 0x15a   :  { %v49_v30 = vrot.slane %v48_v29, 2 }
 0x15c   :  { %v50_v31 = vadd.f32 %v49_v30, %v48_v29 }
 0x15e   :  { %v51_v32 = vrot.slane %v50_v31, 1 }
 0x160   :  { %v52_v33 = vadd.f32 %v51_v32, %v50_v31 }
 0x162   :  { %54 = vst.msk [vmem:[#allocation2] sm:$0x1] %vm53_vm4, %v52_v33 }
 0x163   :  { %91 = shalt.err (!%p88_p4)
}
 0x164   :  { %64 = dma.vmem_to_hbm [thread:$0]  %s62_s1, 16, %s133_s2, [#allocation3]  }
 0x165   :  { %100 = dma.done.wait [#allocation3], 16  }
 0x166   :  { %101 = vsyncadd [#allocation3], 4294967280 }
 0x167   :  { %68 = vsyncpa [#allocation3], 1 }

</bundles_post_ra>
